<compile_context>
chip_gen: v6e
topology: v6e:2x2x1
jax: 0.10.0
libtpu: 0.0.40
codegen_flags: <defaults>
</compile_context>

<pallas_src>
import jax
import jax.numpy as jnp
from jax.experimental import pallas as pl
from jax.experimental.pallas import tpu as pltpu


def _round_up(x, n):
    return ((x + n - 1) // n) * n


def _compl_mul_modes_kernel(xr_ref, xi_ref, wr_ref, wi_ref, or_ref, oi_ref):
    """Per-grid-step block of modes (lane axis = modes, Tm wide).

    xr/xi: (B, Ci, Tm)  real / imag of x_ft modes
    wr/wi: (Ci, Co, Tm) real / imag of weights
    or/oi: (B, Co, Tm)  real / imag of the complex contraction over Ci:
        out[b, o, m] = sum_i x[b, i, m] * w[i, o, m]   (complex)
    VPU-only: broadcast (1, Tm) rows of x against (Co, Tm) weight planes.
    """
    B, Ci, _Tm = xr_ref.shape
    Co = wr_ref.shape[1]

    # Static unrolled loops: B and Ci are small, known at trace time.
    for b in range(B):
        xr_b = xr_ref[b]          # (Ci, Tm)
        xi_b = xi_ref[b]          # (Ci, Tm)
        acc_r = jnp.zeros((Co, _Tm), jnp.float32)
        acc_i = jnp.zeros((Co, _Tm), jnp.float32)
        for i in range(Ci):
            xr_bi = xr_b[i:i + 1, :]      # (1, Tm) -> broadcasts over Co sublanes
            xi_bi = xi_b[i:i + 1, :]
            wr_i = wr_ref[i]              # (Co, Tm)
            wi_i = wi_ref[i]
            acc_r = acc_r + (xr_bi * wr_i - xi_bi * wi_i)
            acc_i = acc_i + (xr_bi * wi_i + xi_bi * wr_i)
        or_ref[b] = acc_r
        oi_ref[b] = acc_i


def spectral_modes_contract(xr, xi, wr, wi, mode_tile):
    """Fused complex contraction over channels for all retained modes.

    xr, xi: float32 (B, Ci, Mpad)   (modes last, padded to multiple of tile)
    wr, wi: float32 (Ci, Co, Mpad)
    returns (o_r, o_i): float32 (B, Co, Mpad)
    """
    B, Ci, Mpad = xr.shape
    Co = wr.shape[1]
    assert Mpad % mode_tile == 0
    grid = (Mpad // mode_tile,)

    flops = 8 * Mpad * B * Ci * Co  # 4 mul + 4 add per complex MAC
    bytes_accessed = 4 * Mpad * (2 * B * Ci + 2 * Ci * Co + 2 * B * Co)

    return pl.pallas_call(
        _compl_mul_modes_kernel,
        out_shape=(
            jax.ShapeDtypeStruct((B, Co, Mpad), jnp.float32),
            jax.ShapeDtypeStruct((B, Co, Mpad), jnp.float32),
        ),
        grid_spec=pltpu.PrefetchScalarGridSpec(
            num_scalar_prefetch=0,
            grid=grid,
            in_specs=[
                pl.BlockSpec((B, Ci, mode_tile), lambda m: (0, 0, m)),
                pl.BlockSpec((B, Ci, mode_tile), lambda m: (0, 0, m)),
                pl.BlockSpec((Ci, Co, mode_tile), lambda m: (0, 0, m)),
                pl.BlockSpec((Ci, Co, mode_tile), lambda m: (0, 0, m)),
            ],
            out_specs=[
                pl.BlockSpec((B, Co, mode_tile), lambda m: (0, 0, m)),
                pl.BlockSpec((B, Co, mode_tile), lambda m: (0, 0, m)),
            ],
        ),
        compiler_params=pltpu.CompilerParams(
            dimension_semantics=("parallel",)),
        cost_estimate=pl.CostEstimate(
            flops=flops, transcendentals=0, bytes_accessed=bytes_accessed),
    )(xr, xi, wr, wi)


class SpectralConv2dPallas:
    """JAX/Pallas port of the PyTorch SpectralConv2d module."""

    def __init__(self, in_channels, out_channels, modes1, modes2, key):
        self.in_channels = in_channels
        self.out_channels = out_channels
        self.modes1 = modes1
        self.modes2 = modes2
        scale = 1.0 / (in_channels * out_channels)
        k1, k2, k3, k4 = jax.random.split(key, 4)
        shape = (in_channels, out_channels, modes1, modes2)
        # torch.rand(dtype=cfloat) -> uniform [0,1) real & imag; mirror that.
        self.weights1 = scale * (
            jax.random.uniform(k1, shape, jnp.float32)
            + 1j * jax.random.uniform(k2, shape, jnp.float32)
        ).astype(jnp.complex64)
        self.weights2 = scale * (
            jax.random.uniform(k3, shape, jnp.float32)
            + 1j * jax.random.uniform(k4, shape, jnp.float32)
        ).astype(jnp.complex64)

        # --- static pre-packing (done once, not per forward) ---------------
        m_per_region = modes1 * modes2
        self.m_total = 2 * m_per_region           # top + bottom regions fused
        m_pad128 = _round_up(self.m_total, 128)   # lane-dense modes axis
        self.mode_tile = min(512, m_pad128)       # many modes per grid step
        self.m_pad = _round_up(self.m_total, self.mode_tile)

        w_all = jnp.concatenate(
            [self.weights1.reshape(in_channels, out_channels, m_per_region),
             self.weights2.reshape(in_channels, out_channels, m_per_region)],
            axis=-1)                              # (Ci, Co, Mtot), modes last
        pad = self.m_pad - self.m_total
        w_all = jnp.pad(w_all, ((0, 0), (0, 0), (0, pad)))
        self._wr = jnp.real(w_all).astype(jnp.float32)   # (Ci, Co, Mpad)
        self._wi = jnp.imag(w_all).astype(jnp.float32)

    def __call__(self, x):
        # x: float32 (B, Cin, H, W)  (NCHW, same as PyTorch)
        B, _, H, W = x.shape
        m1, m2 = self.modes1, self.modes2
        Co = self.out_channels
        Wf = W // 2 + 1
        m_region = m1 * m2
        Mtot = self.m_total

        x_ft = jnp.fft.rfft2(x)  # complex64 (B, Cin, H, Wf)

        # Gather only the retained modes, fused top+bottom, modes-last layout.
        top = x_ft[:, :, :m1, :m2].reshape(B, self.in_channels, m_region)
        bot = x_ft[:, :, -m1:, :m2].reshape(B, self.in_channels, m_region)
        xm = jnp.concatenate([top, bot], axis=-1)           # (B, Ci, Mtot)
        xm = jnp.pad(xm, ((0, 0), (0, 0), (0, self.m_pad - Mtot)))
        xr = jnp.real(xm).astype(jnp.float32)
        xi = jnp.imag(xm).astype(jnp.float32)

        o_r, o_i = spectral_modes_contract(xr, xi, self._wr, self._wi,
                                           self.mode_tile)

        out = (o_r[:, :, :Mtot] + 1j * o_i[:, :, :Mtot]).astype(jnp.complex64)
        top_o = out[:, :, :m_region].reshape(B, Co, m1, m2)
        bot_o = out[:, :, m_region:].reshape(B, Co, m1, m2)

        out_ft = jnp.zeros((B, Co, H, Wf), jnp.complex64)
        out_ft = out_ft.at[:, :, :m1, :m2].set(top_o)
        out_ft = out_ft.at[:, :, -m1:, :m2].set(bot_o)

        return jnp.fft.irfft2(out_ft, s=(H, W))  # float32 (B, Cout, H, W)


def _reference_forward(x, w1, w2, modes1, modes2, out_channels):
    """Pure-JAX reference (mirrors the PyTorch forward) for validation."""
    B, _, H, W = x.shape
    Wf = W // 2 + 1
    x_ft = jnp.fft.rfft2(x)
    out_ft = jnp.zeros((B, out_channels, H, Wf), jnp.complex64)
    out_ft = out_ft.at[:, :, :modes1, :modes2].set(
        jnp.einsum('bixy,ioxy->boxy', x_ft[:, :, :modes1, :modes2], w1))
    out_ft = out_ft.at[:, :, -modes1:, :modes2].set(
        jnp.einsum('bixy,ioxy->boxy', x_ft[:, :, -modes1:, :modes2], w2))
    return jnp.fft.irfft2(out_ft, s=(H, W))


if __name__ == "__main__":
    key = jax.random.PRNGKey(0)
    k_param, k_x = jax.random.split(key)

    B, Cin, Cout, H, W = 2, 4, 4, 16, 16
    modes1, modes2 = 4, 4

    layer = SpectralConv2dPallas(Cin, Cout, modes1, modes2, k_param)
    x = jax.random.normal(k_x, (B, Cin, H, W), jnp.float32)

    y = layer(x)
    y = jax.block_until_ready(y)

    y_ref = _reference_forward(x, layer.weights1, layer.weights2,
                               modes1, modes2, Cout)
    assert y.shape == (B, Cout, H, W)
    assert jnp.allclose(y, y_ref, atol=1e-4, rtol=1e-4)

    print("KERNEL_OK")
</pallas_src>

<mosaic_0001>
module attributes {stable_mosaic.version = 11 : i64} {
  func.func @_compl_mul_modes_kernel(%arg0: i32, %arg1: memref<2x4x128xf32, #tpu.memory_space<vmem>>, %arg2: memref<2x4x128xf32, #tpu.memory_space<vmem>>, %arg3: memref<4x4x128xf32, #tpu.memory_space<vmem>>, %arg4: memref<4x4x128xf32, #tpu.memory_space<vmem>>, %arg5: memref<2x4x128xf32, #tpu.memory_space<vmem>>, %arg6: memref<2x4x128xf32, #tpu.memory_space<vmem>>) attributes {dimension_semantics = [#tpu.dimension_semantics<parallel>], iteration_bounds = array<i64: 1>, scalar_prefetch = 0 : i64, scratch_operands = 0 : i64, tpu.core_type = #tpu.core_type<tc>, window_params = [{transform_indices = @transform_0, window_bounds = array<i64: 2, 4, 128>}, {transform_indices = @transform_1, window_bounds = array<i64: 2, 4, 128>}, {transform_indices = @transform_2, window_bounds = array<i64: 4, 4, 128>}, {transform_indices = @transform_3, window_bounds = array<i64: 4, 4, 128>}, {transform_indices = @transform_4, window_bounds = array<i64: 2, 4, 128>}, {transform_indices = @transform_5, window_bounds = array<i64: 2, 4, 128>}]} {
    %c0 = arith.constant 0 : index
    %c0_0 = arith.constant 0 : index
    %c0_1 = arith.constant 0 : index
    %0 = vector.load %arg1[%c0, %c0_0, %c0_1] : memref<2x4x128xf32, #tpu.memory_space<vmem>>, vector<1x4x128xf32>
    %1 = vector.shape_cast %0 : vector<1x4x128xf32> to vector<4x128xf32>
    %c0_2 = arith.constant 0 : index
    %c0_3 = arith.constant 0 : index
    %c0_4 = arith.constant 0 : index
    %2 = vector.load %arg2[%c0_2, %c0_3, %c0_4] : memref<2x4x128xf32, #tpu.memory_space<vmem>>, vector<1x4x128xf32>
    %3 = vector.shape_cast %2 : vector<1x4x128xf32> to vector<4x128xf32>
    %cst = arith.constant 0.000000e+00 : f32
    %4 = vector.broadcast %cst : f32 to vector<4x128xf32>
    %cst_5 = arith.constant 0.000000e+00 : f32
    %5 = vector.broadcast %cst_5 : f32 to vector<4x128xf32>
    %6 = vector.extract_strided_slice %1 {offsets = [0, 0], sizes = [1, 128], strides = [1, 1]} : vector<4x128xf32> to vector<1x128xf32>
    %7 = vector.extract_strided_slice %3 {offsets = [0, 0], sizes = [1, 128], strides = [1, 1]} : vector<4x128xf32> to vector<1x128xf32>
    %c0_6 = arith.constant 0 : index
    %c0_7 = arith.constant 0 : index
    %c0_8 = arith.constant 0 : index
    %8 = vector.load %arg3[%c0_6, %c0_7, %c0_8] : memref<4x4x128xf32, #tpu.memory_space<vmem>>, vector<1x4x128xf32>
    %9 = vector.shape_cast %8 : vector<1x4x128xf32> to vector<4x128xf32>
    %c0_9 = arith.constant 0 : index
    %c0_10 = arith.constant 0 : index
    %c0_11 = arith.constant 0 : index
    %10 = vector.load %arg4[%c0_9, %c0_10, %c0_11] : memref<4x4x128xf32, #tpu.memory_space<vmem>>, vector<1x4x128xf32>
    %11 = vector.shape_cast %10 : vector<1x4x128xf32> to vector<4x128xf32>
    %12 = vector.broadcast %6 : vector<1x128xf32> to vector<4x128xf32>
    %13 = arith.mulf %12, %9 : vector<4x128xf32>
    %14 = vector.broadcast %7 : vector<1x128xf32> to vector<4x128xf32>
    %15 = arith.mulf %14, %11 : vector<4x128xf32>
    %16 = arith.subf %13, %15 : vector<4x128xf32>
    %17 = arith.addf %4, %16 : vector<4x128xf32>
    %18 = vector.broadcast %6 : vector<1x128xf32> to vector<4x128xf32>
    %19 = arith.mulf %18, %11 : vector<4x128xf32>
    %20 = vector.broadcast %7 : vector<1x128xf32> to vector<4x128xf32>
    %21 = arith.mulf %20, %9 : vector<4x128xf32>
    %22 = arith.addf %19, %21 : vector<4x128xf32>
    %23 = arith.addf %5, %22 : vector<4x128xf32>
    %24 = vector.extract_strided_slice %1 {offsets = [1, 0], sizes = [1, 128], strides = [1, 1]} : vector<4x128xf32> to vector<1x128xf32>
    %25 = vector.extract_strided_slice %3 {offsets = [1, 0], sizes = [1, 128], strides = [1, 1]} : vector<4x128xf32> to vector<1x128xf32>
    %c1 = arith.constant 1 : index
    %c0_12 = arith.constant 0 : index
    %c0_13 = arith.constant 0 : index
    %26 = vector.load %arg3[%c1, %c0_12, %c0_13] : memref<4x4x128xf32, #tpu.memory_space<vmem>>, vector<1x4x128xf32>
    %27 = vector.shape_cast %26 : vector<1x4x128xf32> to vector<4x128xf32>
    %c1_14 = arith.constant 1 : index
    %c0_15 = arith.constant 0 : index
    %c0_16 = arith.constant 0 : index
    %28 = vector.load %arg4[%c1_14, %c0_15, %c0_16] : memref<4x4x128xf32, #tpu.memory_space<vmem>>, vector<1x4x128xf32>
    %29 = vector.shape_cast %28 : vector<1x4x128xf32> to vector<4x128xf32>
    %30 = vector.broadcast %24 : vector<1x128xf32> to vector<4x128xf32>
    %31 = arith.mulf %30, %27 : vector<4x128xf32>
    %32 = vector.broadcast %25 : vector<1x128xf32> to vector<4x128xf32>
    %33 = arith.mulf %32, %29 : vector<4x128xf32>
    %34 = arith.subf %31, %33 : vector<4x128xf32>
    %35 = arith.addf %17, %34 : vector<4x128xf32>
    %36 = vector.broadcast %24 : vector<1x128xf32> to vector<4x128xf32>
    %37 = arith.mulf %36, %29 : vector<4x128xf32>
    %38 = vector.broadcast %25 : vector<1x128xf32> to vector<4x128xf32>
    %39 = arith.mulf %38, %27 : vector<4x128xf32>
    %40 = arith.addf %37, %39 : vector<4x128xf32>
    %41 = arith.addf %23, %40 : vector<4x128xf32>
    %42 = vector.extract_strided_slice %1 {offsets = [2, 0], sizes = [1, 128], strides = [1, 1]} : vector<4x128xf32> to vector<1x128xf32>
    %43 = vector.extract_strided_slice %3 {offsets = [2, 0], sizes = [1, 128], strides = [1, 1]} : vector<4x128xf32> to vector<1x128xf32>
    %c2 = arith.constant 2 : index
    %c0_17 = arith.constant 0 : index
    %c0_18 = arith.constant 0 : index
    %44 = vector.load %arg3[%c2, %c0_17, %c0_18] : memref<4x4x128xf32, #tpu.memory_space<vmem>>, vector<1x4x128xf32>
    %45 = vector.shape_cast %44 : vector<1x4x128xf32> to vector<4x128xf32>
    %c2_19 = arith.constant 2 : index
    %c0_20 = arith.constant 0 : index
    %c0_21 = arith.constant 0 : index
    %46 = vector.load %arg4[%c2_19, %c0_20, %c0_21] : memref<4x4x128xf32, #tpu.memory_space<vmem>>, vector<1x4x128xf32>
    %47 = vector.shape_cast %46 : vector<1x4x128xf32> to vector<4x128xf32>
    %48 = vector.broadcast %42 : vector<1x128xf32> to vector<4x128xf32>
    %49 = arith.mulf %48, %45 : vector<4x128xf32>
    %50 = vector.broadcast %43 : vector<1x128xf32> to vector<4x128xf32>
    %51 = arith.mulf %50, %47 : vector<4x128xf32>
    %52 = arith.subf %49, %51 : vector<4x128xf32>
    %53 = arith.addf %35, %52 : vector<4x128xf32>
    %54 = vector.broadcast %42 : vector<1x128xf32> to vector<4x128xf32>
    %55 = arith.mulf %54, %47 : vector<4x128xf32>
    %56 = vector.broadcast %43 : vector<1x128xf32> to vector<4x128xf32>
    %57 = arith.mulf %56, %45 : vector<4x128xf32>
    %58 = arith.addf %55, %57 : vector<4x128xf32>
    %59 = arith.addf %41, %58 : vector<4x128xf32>
    %60 = vector.extract_strided_slice %1 {offsets = [3, 0], sizes = [1, 128], strides = [1, 1]} : vector<4x128xf32> to vector<1x128xf32>
    %61 = vector.extract_strided_slice %3 {offsets = [3, 0], sizes = [1, 128], strides = [1, 1]} : vector<4x128xf32> to vector<1x128xf32>
    %c3 = arith.constant 3 : index
    %c0_22 = arith.constant 0 : index
    %c0_23 = arith.constant 0 : index
    %62 = vector.load %arg3[%c3, %c0_22, %c0_23] : memref<4x4x128xf32, #tpu.memory_space<vmem>>, vector<1x4x128xf32>
    %63 = vector.shape_cast %62 : vector<1x4x128xf32> to vector<4x128xf32>
    %c3_24 = arith.constant 3 : index
    %c0_25 = arith.constant 0 : index
    %c0_26 = arith.constant 0 : index
    %64 = vector.load %arg4[%c3_24, %c0_25, %c0_26] : memref<4x4x128xf32, #tpu.memory_space<vmem>>, vector<1x4x128xf32>
    %65 = vector.shape_cast %64 : vector<1x4x128xf32> to vector<4x128xf32>
    %66 = vector.broadcast %60 : vector<1x128xf32> to vector<4x128xf32>
    %67 = arith.mulf %66, %63 : vector<4x128xf32>
    %68 = vector.broadcast %61 : vector<1x128xf32> to vector<4x128xf32>
    %69 = arith.mulf %68, %65 : vector<4x128xf32>
    %70 = arith.subf %67, %69 : vector<4x128xf32>
    %71 = arith.addf %53, %70 : vector<4x128xf32>
    %72 = vector.broadcast %60 : vector<1x128xf32> to vector<4x128xf32>
    %73 = arith.mulf %72, %65 : vector<4x128xf32>
    %74 = vector.broadcast %61 : vector<1x128xf32> to vector<4x128xf32>
    %75 = arith.mulf %74, %63 : vector<4x128xf32>
    %76 = arith.addf %73, %75 : vector<4x128xf32>
    %77 = arith.addf %59, %76 : vector<4x128xf32>
    %c0_27 = arith.constant 0 : index
    %c0_28 = arith.constant 0 : index
    %c0_29 = arith.constant 0 : index
    %78 = vector.load %arg5[%c0_27, %c0_28, %c0_29] : memref<2x4x128xf32, #tpu.memory_space<vmem>>, vector<1x4x128xf32>
    %79 = vector.shape_cast %78 : vector<1x4x128xf32> to vector<4x128xf32>
    %80 = vector.shape_cast %71 : vector<4x128xf32> to vector<1x4x128xf32>
    tpu.vector_store %arg5[%c0_27, %c0_28, %c0_29], %80 {strides = array<i32>} : memref<2x4x128xf32, #tpu.memory_space<vmem>>, vector<1x4x128xf32>,
    %c0_30 = arith.constant 0 : index
    %c0_31 = arith.constant 0 : index
    %c0_32 = arith.constant 0 : index
    %81 = vector.load %arg6[%c0_30, %c0_31, %c0_32] : memref<2x4x128xf32, #tpu.memory_space<vmem>>, vector<1x4x128xf32>
    %82 = vector.shape_cast %81 : vector<1x4x128xf32> to vector<4x128xf32>
    %83 = vector.shape_cast %77 : vector<4x128xf32> to vector<1x4x128xf32>
    tpu.vector_store %arg6[%c0_30, %c0_31, %c0_32], %83 {strides = array<i32>} : memref<2x4x128xf32, #tpu.memory_space<vmem>>, vector<1x4x128xf32>,
    %c1_33 = arith.constant 1 : index
    %c0_34 = arith.constant 0 : index
    %c0_35 = arith.constant 0 : index
    %84 = vector.load %arg1[%c1_33, %c0_34, %c0_35] : memref<2x4x128xf32, #tpu.memory_space<vmem>>, vector<1x4x128xf32>
    %85 = vector.shape_cast %84 : vector<1x4x128xf32> to vector<4x128xf32>
    %c1_36 = arith.constant 1 : index
    %c0_37 = arith.constant 0 : index
    %c0_38 = arith.constant 0 : index
    %86 = vector.load %arg2[%c1_36, %c0_37, %c0_38] : memref<2x4x128xf32, #tpu.memory_space<vmem>>, vector<1x4x128xf32>
    %87 = vector.shape_cast %86 : vector<1x4x128xf32> to vector<4x128xf32>
    %cst_39 = arith.constant 0.000000e+00 : f32
    %88 = vector.broadcast %cst_39 : f32 to vector<4x128xf32>
    %cst_40 = arith.constant 0.000000e+00 : f32
    %89 = vector.broadcast %cst_40 : f32 to vector<4x128xf32>
    %90 = vector.extract_strided_slice %85 {offsets = [0, 0], sizes = [1, 128], strides = [1, 1]} : vector<4x128xf32> to vector<1x128xf32>
    %91 = vector.extract_strided_slice %87 {offsets = [0, 0], sizes = [1, 128], strides = [1, 1]} : vector<4x128xf32> to vector<1x128xf32>
    %c0_41 = arith.constant 0 : index
    %c0_42 = arith.constant 0 : index
    %c0_43 = arith.constant 0 : index
    %92 = vector.load %arg3[%c0_41, %c0_42, %c0_43] : memref<4x4x128xf32, #tpu.memory_space<vmem>>, vector<1x4x128xf32>
    %93 = vector.shape_cast %92 : vector<1x4x128xf32> to vector<4x128xf32>
    %c0_44 = arith.constant 0 : index
    %c0_45 = arith.constant 0 : index
    %c0_46 = arith.constant 0 : index
    %94 = vector.load %arg4[%c0_44, %c0_45, %c0_46] : memref<4x4x128xf32, #tpu.memory_space<vmem>>, vector<1x4x128xf32>
    %95 = vector.shape_cast %94 : vector<1x4x128xf32> to vector<4x128xf32>
    %96 = vector.broadcast %90 : vector<1x128xf32> to vector<4x128xf32>
    %97 = arith.mulf %96, %93 : vector<4x128xf32>
    %98 = vector.broadcast %91 : vector<1x128xf32> to vector<4x128xf32>
    %99 = arith.mulf %98, %95 : vector<4x128xf32>
    %100 = arith.subf %97, %99 : vector<4x128xf32>
    %101 = arith.addf %88, %100 : vector<4x128xf32>
    %102 = vector.broadcast %90 : vector<1x128xf32> to vector<4x128xf32>
    %103 = arith.mulf %102, %95 : vector<4x128xf32>
    %104 = vector.broadcast %91 : vector<1x128xf32> to vector<4x128xf32>
    %105 = arith.mulf %104, %93 : vector<4x128xf32>
    %106 = arith.addf %103, %105 : vector<4x128xf32>
    %107 = arith.addf %89, %106 : vector<4x128xf32>
    %108 = vector.extract_strided_slice %85 {offsets = [1, 0], sizes = [1, 128], strides = [1, 1]} : vector<4x128xf32> to vector<1x128xf32>
    %109 = vector.extract_strided_slice %87 {offsets = [1, 0], sizes = [1, 128], strides = [1, 1]} : vector<4x128xf32> to vector<1x128xf32>
    %c1_47 = arith.constant 1 : index
    %c0_48 = arith.constant 0 : index
    %c0_49 = arith.constant 0 : index
    %110 = vector.load %arg3[%c1_47, %c0_48, %c0_49] : memref<4x4x128xf32, #tpu.memory_space<vmem>>, vector<1x4x128xf32>
    %111 = vector.shape_cast %110 : vector<1x4x128xf32> to vector<4x128xf32>
    %c1_50 = arith.constant 1 : index
    %c0_51 = arith.constant 0 : index
    %c0_52 = arith.constant 0 : index
    %112 = vector.load %arg4[%c1_50, %c0_51, %c0_52] : memref<4x4x128xf32, #tpu.memory_space<vmem>>, vector<1x4x128xf32>
    %113 = vector.shape_cast %112 : vector<1x4x128xf32> to vector<4x128xf32>
    %114 = vector.broadcast %108 : vector<1x128xf32> to vector<4x128xf32>
    %115 = arith.mulf %114, %111 : vector<4x128xf32>
    %116 = vector.broadcast %109 : vector<1x128xf32> to vector<4x128xf32>
    %117 = arith.mulf %116, %113 : vector<4x128xf32>
    %118 = arith.subf %115, %117 : vector<4x128xf32>
    %119 = arith.addf %101, %118 : vector<4x128xf32>
    %120 = vector.broadcast %108 : vector<1x128xf32> to vector<4x128xf32>
    %121 = arith.mulf %120, %113 : vector<4x128xf32>
    %122 = vector.broadcast %109 : vector<1x128xf32> to vector<4x128xf32>
    %123 = arith.mulf %122, %111 : vector<4x128xf32>
    %124 = arith.addf %121, %123 : vector<4x128xf32>
    %125 = arith.addf %107, %124 : vector<4x128xf32>
    %126 = vector.extract_strided_slice %85 {offsets = [2, 0], sizes = [1, 128], strides = [1, 1]} : vector<4x128xf32> to vector<1x128xf32>
    %127 = vector.extract_strided_slice %87 {offsets = [2, 0], sizes = [1, 128], strides = [1, 1]} : vector<4x128xf32> to vector<1x128xf32>
    %c2_53 = arith.constant 2 : index
    %c0_54 = arith.constant 0 : index
    %c0_55 = arith.constant 0 : index
    %128 = vector.load %arg3[%c2_53, %c0_54, %c0_55] : memref<4x4x128xf32, #tpu.memory_space<vmem>>, vector<1x4x128xf32>
    %129 = vector.shape_cast %128 : vector<1x4x128xf32> to vector<4x128xf32>
    %c2_56 = arith.constant 2 : index
    %c0_57 = arith.constant 0 : index
    %c0_58 = arith.constant 0 : index
    %130 = vector.load %arg4[%c2_56, %c0_57, %c0_58] : memref<4x4x128xf32, #tpu.memory_space<vmem>>, vector<1x4x128xf32>
    %131 = vector.shape_cast %130 : vector<1x4x128xf32> to vector<4x128xf32>
    %132 = vector.broadcast %126 : vector<1x128xf32> to vector<4x128xf32>
    %133 = arith.mulf %132, %129 : vector<4x128xf32>
    %134 = vector.broadcast %127 : vector<1x128xf32> to vector<4x128xf32>
    %135 = arith.mulf %134, %131 : vector<4x128xf32>
    %136 = arith.subf %133, %135 : vector<4x128xf32>
    %137 = arith.addf %119, %136 : vector<4x128xf32>
    %138 = vector.broadcast %126 : vector<1x128xf32> to vector<4x128xf32>
    %139 = arith.mulf %138, %131 : vector<4x128xf32>
    %140 = vector.broadcast %127 : vector<1x128xf32> to vector<4x128xf32>
    %141 = arith.mulf %140, %129 : vector<4x128xf32>
    %142 = arith.addf %139, %141 : vector<4x128xf32>
    %143 = arith.addf %125, %142 : vector<4x128xf32>
    %144 = vector.extract_strided_slice %85 {offsets = [3, 0], sizes = [1, 128], strides = [1, 1]} : vector<4x128xf32> to vector<1x128xf32>
    %145 = vector.extract_strided_slice %87 {offsets = [3, 0], sizes = [1, 128], strides = [1, 1]} : vector<4x128xf32> to vector<1x128xf32>
    %c3_59 = arith.constant 3 : index
    %c0_60 = arith.constant 0 : index
    %c0_61 = arith.constant 0 : index
    %146 = vector.load %arg3[%c3_59, %c0_60, %c0_61] : memref<4x4x128xf32, #tpu.memory_space<vmem>>, vector<1x4x128xf32>
    %147 = vector.shape_cast %146 : vector<1x4x128xf32> to vector<4x128xf32>
    %c3_62 = arith.constant 3 : index
    %c0_63 = arith.constant 0 : index
    %c0_64 = arith.constant 0 : index
    %148 = vector.load %arg4[%c3_62, %c0_63, %c0_64] : memref<4x4x128xf32, #tpu.memory_space<vmem>>, vector<1x4x128xf32>
    %149 = vector.shape_cast %148 : vector<1x4x128xf32> to vector<4x128xf32>
    %150 = vector.broadcast %144 : vector<1x128xf32> to vector<4x128xf32>
    %151 = arith.mulf %150, %147 : vector<4x128xf32>
    %152 = vector.broadcast %145 : vector<1x128xf32> to vector<4x128xf32>
    %153 = arith.mulf %152, %149 : vector<4x128xf32>
    %154 = arith.subf %151, %153 : vector<4x128xf32>
    %155 = arith.addf %137, %154 : vector<4x128xf32>
    %156 = vector.broadcast %144 : vector<1x128xf32> to vector<4x128xf32>
    %157 = arith.mulf %156, %149 : vector<4x128xf32>
    %158 = vector.broadcast %145 : vector<1x128xf32> to vector<4x128xf32>
    %159 = arith.mulf %158, %147 : vector<4x128xf32>
    %160 = arith.addf %157, %159 : vector<4x128xf32>
    %161 = arith.addf %143, %160 : vector<4x128xf32>
    %c1_65 = arith.constant 1 : index
    %c0_66 = arith.constant 0 : index
    %c0_67 = arith.constant 0 : index
    %162 = vector.load %arg5[%c1_65, %c0_66, %c0_67] : memref<2x4x128xf32, #tpu.memory_space<vmem>>, vector<1x4x128xf32>
    %163 = vector.shape_cast %162 : vector<1x4x128xf32> to vector<4x128xf32>
    %164 = vector.shape_cast %155 : vector<4x128xf32> to vector<1x4x128xf32>
    tpu.vector_store %arg5[%c1_65, %c0_66, %c0_67], %164 {strides = array<i32>} : memref<2x4x128xf32, #tpu.memory_space<vmem>>, vector<1x4x128xf32>,
    %c1_68 = arith.constant 1 : index
    %c0_69 = arith.constant 0 : index
    %c0_70 = arith.constant 0 : index
    %165 = vector.load %arg6[%c1_68, %c0_69, %c0_70] : memref<2x4x128xf32, #tpu.memory_space<vmem>>, vector<1x4x128xf32>
    %166 = vector.shape_cast %165 : vector<1x4x128xf32> to vector<4x128xf32>
    %167 = vector.shape_cast %161 : vector<4x128xf32> to vector<1x4x128xf32>
    tpu.vector_store %arg6[%c1_68, %c0_69, %c0_70], %167 {strides = array<i32>} : memref<2x4x128xf32, #tpu.memory_space<vmem>>, vector<1x4x128xf32>,
    return
  }
  func.func @transform_0(%arg0: i32) -> (i32, i32, i32) {
    %c0_i32 = arith.constant 0 : i32
    %c0_i32_0 = arith.constant 0 : i32
    %c0_i32_1 = arith.constant 0 : i32
    return %c0_i32, %c0_i32_0, %arg0 : i32, i32, i32
  }
  func.func @transform_1(%arg0: i32) -> (i32, i32, i32) {
    %c0_i32 = arith.constant 0 : i32
    %c0_i32_0 = arith.constant 0 : i32
    %c0_i32_1 = arith.constant 0 : i32
    return %c0_i32, %c0_i32_0, %arg0 : i32, i32, i32
  }
  func.func @transform_2(%arg0: i32) -> (i32, i32, i32) {
    %c0_i32 = arith.constant 0 : i32
    %c0_i32_0 = arith.constant 0 : i32
    %c0_i32_1 = arith.constant 0 : i32
    return %c0_i32, %c0_i32_0, %arg0 : i32, i32, i32
  }
  func.func @transform_3(%arg0: i32) -> (i32, i32, i32) {
    %c0_i32 = arith.constant 0 : i32
    %c0_i32_0 = arith.constant 0 : i32
    %c0_i32_1 = arith.constant 0 : i32
    return %c0_i32, %c0_i32_0, %arg0 : i32, i32, i32
  }
  func.func @transform_4(%arg0: i32) -> (i32, i32, i32) {
    %c0_i32 = arith.constant 0 : i32
    %c0_i32_0 = arith.constant 0 : i32
    %c0_i32_1 = arith.constant 0 : i32
    return %c0_i32, %c0_i32_0, %arg0 : i32, i32, i32
  }
  func.func @transform_5(%arg0: i32) -> (i32, i32, i32) {
    %c0_i32 = arith.constant 0 : i32
    %c0_i32_0 = arith.constant 0 : i32
    %c0_i32_1 = arith.constant 0 : i32
    return %c0_i32, %c0_i32_0, %arg0 : i32, i32, i32
  }
}

</mosaic_0001>

<bundles_post_ra>
// kernel: tpu_custom_call.1
= control target key start
LH: loop header
LB: loop body
LE: loop exit
PB: predicated region body
PF: predicated region fallthrough
CT: control target
= control target key end

     0   :  { %11 = vsyncpa [#allocation3], 0  ;;  %s497_s0 = inlined_call_operand.hbm [shape: f32[2,4,128], index: 0, kind: input, shape index: {}]   ;;  %s498_s1 = inlined_call_operand.hbm [shape: f32[2,4,128], index: 1, kind: input, shape index: {}]   ;;  %s499_s2 = inlined_call_operand.hbm [shape: f32[4,4,128], index: 2, kind: input, shape index: {}]   ;;  %s500_s3 = inlined_call_operand.hbm [shape: f32[4,4,128], index: 3, kind: input, shape index: {}]   ;;  %s501_s4 = inlined_call_operand.hbm [shape: f32[2,4,128], index: 4, kind: output, shape index: {0}]   ;;  %s502_s5 = inlined_call_operand.hbm [shape: f32[2,4,128], index: 5, kind: output, shape index: {1}]  }
   0x1   :  { %12 = vsyncpa [#allocation6], 0 }
   0x2   :  { %13 = vsyncpa [#allocation9], 0 }
   0x3   :  { %14 = vsyncpa [#allocation4], 0 }
   0x4   :  { %15 = vsyncpa [#allocation12], 0  ;;  %s411_s18 = smov [#allocation5]   ;;  %s412_s20 = smov [#allocation2]  }
   0x5   :  { %s33_s19 = sshll.u32 %s411_s18, 4  ;;  %s21_s21 = sshll.u32 %s412_s20, 4  ;;  %s34_s19 = int_to_ptr.vmem [resolvable:$true] %s33_s19  ;;  %s22_s21 = int_to_ptr.vmem [resolvable:$true] %s21_s21 }
   0x6   :  { %s289_s22 = scalar_lea.vmem %s34_s19, 128  ;;  %p294_p1 = scmp.lt.s32.totalorder %s34_s19, %s34_s19 }
   0x7   :  { %p290_p0 = scmp.ne.s32.totalorder %s34_s19, %s289_s22  ;;  %p295_p2 = scmp.lt.s32.totalorder %s289_s22, %s289_s22 }
   0x9   :  { %p296_p3 = por %p295_p2, %p294_p1 }
   0xb   :  { %p297_p4 = pnand %p296_p3, %p290_p0 }
   0xd   :  { %300 = shalt.err (!%p297_p4)
}
   0xe   :  { %s413_s23 = smov 64   ;;  %s414_s24 = smov 4  }
   0xf   :  { %39 = dma.hbm_to_vmem [thread:$0]  %s498_s1, 128, %s34_s19, [#allocation6], %s413_s23, %s413_s23, %s414_s24  }
  0x10   :  { %s309_s27 = scalar_lea.vmem %s22_s21, 128  ;;  %p314_p6 = scmp.lt.s32.totalorder %s22_s21, %s22_s21 }
  0x11   :  { %p310_p5 = scmp.ne.s32.totalorder %s22_s21, %s309_s27  ;;  %p315_p7 = scmp.lt.s32.totalorder %s309_s27, %s309_s27 }
  0x13   :  { %p316_p8 = por %p315_p7, %p314_p6 }
  0x15   :  { %p317_p9 = pnand %p316_p8, %p310_p5 }
  0x17   :  { %320 = shalt.err (!%p317_p9)
}
  0x18   :  { %27 = dma.hbm_to_vmem [thread:$0]  %s497_s0, 128, %s22_s21, [#allocation3], %s413_s23, %s413_s23, %s414_s24  }
  0x19   :  { %s415_s30 = smov [#allocation7]   ;;  %s416_s7 = smov [#allocation8]  }
  0x1a   :  { %s45_s6 = sshll.u32 %s415_s30, 4  ;;  %s57_s8 = sshll.u32 %s416_s7, 4  ;;  %s46_s6 = int_to_ptr.vmem [resolvable:$true] %s45_s6  ;;  %s58_s8 = int_to_ptr.vmem [resolvable:$true] %s57_s8 }
  0x1b   :  { %s329_s1 = scalar_lea.vmem %s46_s6, 256  ;;  %p334_p11 = scmp.lt.s32.totalorder %s46_s6, %s46_s6 }
  0x1c   :  { %p330_p10 = scmp.ne.s32.totalorder %s46_s6, %s329_s1  ;;  %p335_p12 = scmp.lt.s32.totalorder %s329_s1, %s329_s1 }
  0x1e   :  { %p336_p13 = por %p335_p12, %p334_p11 }
  0x20   :  { %p337_p0 = pnand %p336_p13, %p330_p10 }
  0x22   :  { %340 = shalt.err (!%p337_p0)
}
  0x23   :  { %51 = dma.hbm_to_vmem [thread:$0]  %s499_s2, 256, %s46_s6, [#allocation6], %s413_s23, %s413_s23, %s414_s24  }
  0x24   :  { %s349_s0 = scalar_lea.vmem %s58_s8, 256  ;;  %p354_p2 = scmp.lt.s32.totalorder %s58_s8, %s58_s8 }
  0x25   :  { %p350_p1 = scmp.ne.s32.totalorder %s58_s8, %s349_s0  ;;  %p355_p3 = scmp.lt.s32.totalorder %s349_s0, %s349_s0 }
  0x27   :  { %p356_p4 = por %p355_p3, %p354_p2 }
  0x29   :  { %p357_p5 = pnand %p356_p4, %p350_p1 }
  0x2b   :  { %360 = shalt.err (!%p357_p5)
}
  0x2c   :  { %63 = dma.hbm_to_vmem [thread:$0]  %s500_s3, 256, %s58_s8, [#allocation9], %s413_s23, %s413_s23, %s414_s24  }
  0x2d   :  { %401 = dma.done.wait [#allocation3], 128  }
  0x2e   :  { %402 = vsyncadd [#allocation3], 4294967168 }
  0x2f   :  { %403 = dma.done.wait [#allocation6], 384  }
  0x30   :  { %404 = vsyncadd [#allocation6], 4294966912 }
  0x31   :  { %405 = dma.done.wait [#allocation9], 256  }
  0x32   :  { %406 = vsyncadd [#allocation9], 4294967040  ;;  %v80_v0 = vlaneseq  ;;  %v76_v6 = vld [vmem:[#allocation2] sm:$0xf]  ;;  %v77_v7 = vld [vmem:[#allocation5] sm:$0xf] }
  0x33   :  { %v78_v8 = vld [vmem:[#allocation7] sm:$0xf]  ;;  %v79_v9 = vld [vmem:[#allocation8] sm:$0xf]  ;;  %v97_v12 = vld [vmem:[#allocation7 + $0x4] sm:$0xf] }
  0x34   :  { %v81_v1 = vshrl.u32 %v80_v0, 7  ;;  %v99_v13 = vld [vmem:[#allocation8 + $0x4] sm:$0xf]  ;;  %v117_v16 = vld [vmem:[#allocation7 + $0x8] sm:$0xf]  ;;  %s417_s2 = smov [#allocation10]  }
  0x35   :  { %v119_v17 = vld [vmem:[#allocation8 + $0x8] sm:$0xf]  ;;  %v137_v20 = vld [vmem:[#allocation7 + $0xc] sm:$0xf]  ;;  %v139_v27 = vld [vmem:[#allocation8 + $0xc] sm:$0xf] }
  0x36   :  { %v82_v2 = vsub.s32 0, %v81_v1  ;;  %v102_v3 = vsub.s32 1, %v81_v1  ;;  %v473_v4 = vsub.s32 2, %v81_v1  ;;  %v475_v5 = vsub.s32 3, %v81_v1  ;;  %v159_v36 = vld [vmem:[#allocation2 + $0x4] sm:$0xf] }
  0x37   :  { %v161_v41 = vld [vmem:[#allocation5 + $0x4] sm:$0xf]  ;;  %v162_v46 = vld [vmem:[#allocation7] sm:$0xf]  ;;  %v163_v50 = vld [vmem:[#allocation8] sm:$0xf] }
  0x38   :  { %v83_v10 = vrot.slane %v76_v6, %v82_v2  ;;  %v88_v11 = vrot.slane %v77_v7, %v82_v2  ;;  %v103_v14 = vrot.slane %v76_v6, %v102_v3  ;;  %v108_v15 = vrot.slane %v77_v7, %v102_v3  ;;  %v180_v52 = vld [vmem:[#allocation7 + $0x4] sm:$0xf]  ;;  %v181_v56 = vld [vmem:[#allocation8 + $0x4] sm:$0xf]  ;;  %v198_v62 = vld [vmem:[#allocation7 + $0x8] sm:$0xf] }
  0x39   :  { %v123_v18 = vrot.slane %v76_v6, %v473_v4  ;;  %v128_v19 = vrot.slane %v77_v7, %v473_v4  ;;  %v143_v21 = vrot.slane %v76_v6, %v475_v5  ;;  %v148_v22 = vrot.slane %v77_v7, %v475_v5  ;;  %v199_v6 = vld [vmem:[#allocation8 + $0x8] sm:$0xf]  ;;  %s243_s3 = sshll.u32 %s417_s2, 4  ;;  %s418_s13 = smov [#allocation11]   ;;  %s244_s3 = int_to_ptr.vmem [resolvable:$true] %s243_s3 }
  0x3a   :  { %v84_v23 = vmul.f32 %v83_v10, %v78_v8  ;;  %v89_v24 = vmul.f32 %v88_v11, %v79_v9  ;;  %v104_v25 = vmul.f32 %v103_v14, %v97_v12  ;;  %v109_v26 = vmul.f32 %v108_v15, %v99_v13  ;;  %s255_s14 = sshll.u32 %s418_s13, 4  ;;  %s361_s15 = scalar_lea.vmem %s244_s3, 128  ;;  %s256_s14 = int_to_ptr.vmem [resolvable:$true] %s255_s14 }
  0x3b   :  { %v124_v28 = vmul.f32 %v123_v18, %v117_v16  ;;  %v129_v29 = vmul.f32 %v128_v19, %v119_v17  ;;  %v144_v30 = vmul.f32 %v143_v21, %v137_v20  ;;  %v149_v31 = vmul.f32 %v148_v22, %v139_v27  ;;  %p362_p6 = scmp.ne.s32.totalorder %s244_s3, %s361_s15  ;;  %p366_p7 = scmp.lt.s32.totalorder %s244_s3, %s244_s3 }
  0x3c   :  { %v90_v32 = vsub.f32 %v84_v23, %v89_v24  ;;  %v110_v33 = vsub.f32 %v104_v25, %v109_v26  ;;  %v92_v34 = vmul.f32 %v83_v10, %v79_v9  ;;  %v93_v35 = vmul.f32 %v88_v11, %v78_v8  ;;  %v216_v8 = vld [vmem:[#allocation7 + $0xc] sm:$0xf]  ;;  %p367_p8 = scmp.lt.s32.totalorder %s361_s15, %s361_s15 }
  0x3d   :  { %v130_v37 = vsub.f32 %v124_v28, %v129_v29  ;;  %v150_v38 = vsub.f32 %v144_v30, %v149_v31  ;;  %v112_v39 = vmul.f32 %v103_v14, %v99_v13  ;;  %v113_v40 = vmul.f32 %v108_v15, %v97_v12  ;;  %v217_v12 = vld [vmem:[#allocation8 + $0xc] sm:$0xf] }
  0x3e   :  { %v111_v42 = vadd.f32 %v110_v33, %v90_v32  ;;  %v94_v43 = vadd.f32 %v93_v35, %v92_v34  ;;  %v132_v44 = vmul.f32 %v123_v18, %v119_v17  ;;  %v133_v45 = vmul.f32 %v128_v19, %v117_v16  ;;  %p368_p9 = por %p367_p8, %p366_p7 }
  0x3f   :  { %v114_v47 = vadd.f32 %v113_v40, %v112_v39  ;;  %v152_v48 = vmul.f32 %v143_v21, %v139_v27  ;;  %v153_v49 = vmul.f32 %v148_v22, %v137_v20  ;;  %v167_v51 = vrot.slane %v159_v36, %v82_v2 }
  0x40   :  { %v131_v53 = vadd.f32 %v130_v37, %v111_v42  ;;  %v134_v54 = vadd.f32 %v133_v45, %v132_v44  ;;  %v172_v55 = vrot.slane %v161_v41, %v82_v2  ;;  %v185_v57 = vrot.slane %v159_v36, %v102_v3  ;;  %p369_p10 = pnand %p368_p9, %p362_p6 }
  0x41   :  { %v115_v58 = vadd.f32 %v114_v47, %v94_v43  ;;  %v154_v59 = vadd.f32 %v153_v49, %v152_v48  ;;  %v168_v60 = vmul.f32 %v167_v51, %v162_v46  ;;  %v190_v61 = vrot.slane %v161_v41, %v102_v3 }
  0x42   :  { %v151_v63 = vadd.f32 %v150_v38, %v131_v53  ;;  %v173_v0 = vmul.f32 %v172_v55, %v163_v50  ;;  %v186_v1 = vmul.f32 %v185_v57, %v180_v52  ;;  %v203_v7 = vrot.slane %v159_v36, %v473_v4 }
  0x43   :  { %v135_v9 = vadd.f32 %v134_v54, %v115_v58  ;;  %v191_v10 = vmul.f32 %v190_v61, %v181_v56  ;;  %v208_v11 = vrot.slane %v161_v41, %v473_v4  ;;  %v221_v2 = vrot.slane %v159_v36, %v475_v5 }
  0x44   :  { %156 = vst [vmem:[#allocation10] sm:$0xf] %v151_v63  ;;  %v174_v13 = vsub.f32 %v168_v60, %v173_v0  ;;  %v204_v14 = vmul.f32 %v203_v7, %v198_v62  ;;  %v226_v3 = vrot.slane %v161_v41, %v475_v5  ;;  %v176_v15 = vmul.f32 %v167_v51, %v163_v50 }
  0x45   :  { %v155_v16 = vadd.f32 %v154_v59, %v135_v9  ;;  %v192_v17 = vsub.f32 %v186_v1, %v191_v10  ;;  %v209_v18 = vmul.f32 %v208_v11, %v199_v6  ;;  %v222_v19 = vmul.f32 %v221_v2, %v216_v8 }
  0x46   :  { %v227_v20 = vmul.f32 %v226_v3, %v217_v12  ;;  %v177_v21 = vmul.f32 %v172_v55, %v162_v46  ;;  %v194_v22 = vmul.f32 %v185_v57, %v181_v56  ;;  %v195_v23 = vmul.f32 %v190_v61, %v180_v52 }
  0x47   :  { %157 = vst [vmem:[#allocation11] sm:$0xf] %v155_v16  ;;  %v193_v24 = vadd.f32 %v192_v17, %v174_v13  ;;  %v210_v4 = vsub.f32 %v204_v14, %v209_v18  ;;  %v212_v25 = vmul.f32 %v203_v7, %v199_v6  ;;  %v213_v26 = vmul.f32 %v208_v11, %v198_v62 }
  0x48   :  { %v228_v27 = vsub.f32 %v222_v19, %v227_v20  ;;  %v178_v28 = vadd.f32 %v177_v21, %v176_v15  ;;  %v196_v29 = vadd.f32 %v195_v23, %v194_v22  ;;  %v230_v30 = vmul.f32 %v221_v2, %v217_v12 }
  0x49   :  { %v211_v5 = vadd.f32 %v210_v4, %v193_v24  ;;  %v214_v31 = vadd.f32 %v213_v26, %v212_v25  ;;  %v231_v32 = vmul.f32 %v226_v3, %v216_v8 }
  0x4a   :  { %v197_v33 = vadd.f32 %v196_v29, %v178_v28 }
  0x4b   :  { %v229_v34 = vadd.f32 %v228_v27, %v211_v5  ;;  %v232_v35 = vadd.f32 %v231_v32, %v230_v30 }
  0x4c   :  { %v215_v36 = vadd.f32 %v214_v31, %v197_v33 }
  0x4d   :  { %235 = vst [vmem:[#allocation10 + $0x4] sm:$0xf] %v229_v34 }
  0x4e   :  { %v233_v37 = vadd.f32 %v232_v35, %v215_v36 }
  0x4f   :  { %372 = shalt.err (!%p369_p10)
}
  0x50   :  { %249 = dma.vmem_to_hbm [thread:$0]  %s244_s3, 128, %s501_s4, [#allocation4], %s413_s23, %s413_s23, %s414_s24   ;;  %237 = vst [vmem:[#allocation11 + $0x4] sm:$0xf] %v233_v37 }
  0x51   :  { %s381_s18 = scalar_lea.vmem %s256_s14, 128  ;;  %p386_p12 = scmp.lt.s32.totalorder %s256_s14, %s256_s14 }
  0x52   :  { %p382_p11 = scmp.ne.s32.totalorder %s256_s14, %s381_s18  ;;  %p387_p13 = scmp.lt.s32.totalorder %s381_s18, %s381_s18 }
  0x54   :  { %p388_p0 = por %p387_p13, %p386_p12 }
  0x56   :  { %p389_p1 = pnand %p388_p0, %p382_p11 }
  0x58   :  { %392 = shalt.err (!%p389_p1)
}
  0x59   :  { %261 = dma.vmem_to_hbm [thread:$0]  %s256_s14, 128, %s502_s5, [#allocation12], %s413_s23, %s413_s23, %s414_s24  }
  0x5a   :  { %407 = dma.done.wait [#allocation4], 128  }
  0x5b   :  { %408 = vsyncadd [#allocation4], 4294967168 }
  0x5c   :  { %409 = dma.done.wait [#allocation12], 128  }
  0x5d   :  { %410 = vsyncadd [#allocation12], 4294967168 }
  0x5e   :  { %268 = vsyncpa [#allocation3], 1 }
  0x5f   :  { %269 = vsyncpa [#allocation6], 1 }
  0x60   :  { %270 = vsyncpa [#allocation9], 1 }
  0x61   :  { %271 = vsyncpa [#allocation4], 1 }
  0x62   :  { %272 = vsyncpa [#allocation12], 1 }

</bundles_post_ra>
